<compile_context>
chip_gen: v7x
topology: tpu7x:2x2x1
jax: 0.10.0
libtpu: 0.0.40
codegen_flags: <defaults>
</compile_context>

<pallas_src>
import jax
import jax.numpy as jnp
from jax.experimental import pallas as pl
from jax.experimental.pallas import tpu as pltpu


def _cdiv(a, b):
    return (a + b - 1) // b


def _round_up(x, m):
    return ((x + m - 1) // m) * m


def _choose_batch_tile(B, block_b):
    """Lane-axis batch tile: multiple of 128, or the whole batch for small B."""
    if B <= 512:
        # Tiny batch (e.g. single env step): one tile equal to the full dim.
        return B
    # At least 2 grid steps so the "parallel" axis can shard across v7x's 2 TCs.
    n_steps = max(2, _cdiv(B, block_b))
    return _round_up(_cdiv(B, n_steps), 128)


def _actor_kernel(max_action, action_dim):
    def kernel(xT_ref, w1_ref, b1_ref, w2_ref, b2_ref, wh_ref, bh_ref,
               mu_ref, std_ref):
        xT = xT_ref[...]                                   # (state_dim, TB) bf16

        # layer 1: relu(W1^T @ x^T + b1), f32 accumulate, bf16 for next MXU pass
        h1 = jnp.dot(w1_ref[...], xT, preferred_element_type=jnp.float32)
        h1 = jnp.maximum(h1 + b1_ref[...], 0.0).astype(jnp.bfloat16)

        # layer 2
        h2 = jnp.dot(w2_ref[...], h1, preferred_element_type=jnp.float32)
        h2 = jnp.maximum(h2 + b2_ref[...], 0.0).astype(jnp.bfloat16)

        # fused heads: one (2A, hidden) @ (hidden, TB) matmul -> [mu_pre ; log_std_pre]
        heads = jnp.dot(wh_ref[...], h2, preferred_element_type=jnp.float32)
        heads = heads + bh_ref[...]

        mu_pre = heads[:action_dim, :]
        ls_pre = heads[action_dim:, :]

        mu_ref[...] = (max_action * jnp.tanh(mu_pre)).astype(mu_ref.dtype)
        std_ref[...] = jnp.exp(jnp.clip(ls_pre, -20.0, 2.0)).astype(std_ref.dtype)

    return kernel


def prepare_params(params, compute_dtype=jnp.bfloat16):
    """One-time parameter prep: fuse heads, transpose to feature-major, cast to bf16.

    Input `params` holds (in, out) weights and (1, out) biases (see init_params).
    """
    w_head = jnp.concatenate([params["wmu"], params["wls"]], axis=1)   # (hidden, 2A)
    b_head = jnp.concatenate([params["bmu"], params["bls"]], axis=1)   # (1, 2A)
    return dict(
        w1_t=params["w1"].T.astype(compute_dtype),   # (hidden, state_dim)
        b1_c=params["b1"].T.astype(jnp.float32),     # (hidden, 1)
        w2_t=params["w2"].T.astype(compute_dtype),   # (hidden, hidden)
        b2_c=params["b2"].T.astype(jnp.float32),     # (hidden, 1)
        wh_t=w_head.T.astype(compute_dtype),         # (2A, hidden)
        bh_c=b_head.T.astype(jnp.float32),           # (2A, 1)
    )


def actor_forward(state, prepped, max_action, *, block_b=4096):
    """state: (B, state_dim) float32; prepped: output of prepare_params.

    Returns (mu, std), each (B, action_dim) float32.
    """
    B, state_dim = state.shape
    hidden = prepped["w1_t"].shape[0]
    two_a = prepped["wh_t"].shape[0]
    action_dim = two_a // 2
    compute_dtype = prepped["w1_t"].dtype

    # Feature-major bf16 input: single fused cast+transpose pass in XLA.
    xT = state.astype(compute_dtype).T                     # (state_dim, B)

    TB = _choose_batch_tile(B, block_b)
    grid = (_cdiv(B, TB),)

    resident = lambda shape: pl.BlockSpec(shape, lambda i: (0, 0))

    flops = 2 * B * (state_dim * hidden + hidden * hidden + hidden * two_a)
    transcendentals = 2 * B * action_dim   # tanh + exp per action lane per row
    bytes_accessed = (
        xT.size * xT.dtype.itemsize
        + sum(prepped[k].size * prepped[k].dtype.itemsize for k in prepped)
        + 2 * B * action_dim * 4
    )

    mu_t, std_t = pl.pallas_call(
        _actor_kernel(float(max_action), action_dim),
        out_shape=(
            jax.ShapeDtypeStruct((action_dim, B), jnp.float32),
            jax.ShapeDtypeStruct((action_dim, B), jnp.float32),
        ),
        grid=grid,
        in_specs=[
            pl.BlockSpec((state_dim, TB), lambda i: (0, i)),   # x^T, batch on lanes
            resident((hidden, state_dim)),                     # W1^T
            resident((hidden, 1)),                             # b1 (column)
            resident((hidden, hidden)),                        # W2^T
            resident((hidden, 1)),                             # b2 (column)
            resident((two_a, hidden)),                         # [Wmu ; Wls]^T
            resident((two_a, 1)),                              # [bmu ; bls] (column)
        ],
        out_specs=(
            pl.BlockSpec((action_dim, TB), lambda i: (0, i)),  # mu^T
            pl.BlockSpec((action_dim, TB), lambda i: (0, i)),  # std^T
        ),
        compiler_params=pltpu.CompilerParams(
            dimension_semantics=("parallel",),
        ),
        cost_estimate=pl.CostEstimate(
            flops=flops,
            transcendentals=transcendentals,
            bytes_accessed=bytes_accessed,
        ),
    )(xT, prepped["w1_t"], prepped["b1_c"], prepped["w2_t"], prepped["b2_c"],
      prepped["wh_t"], prepped["bh_c"])

    # Batch-major views for API parity with the PyTorch module. Consumers that
    # can take feature-major (action_dim, B) buffers should use mu_t / std_t
    # directly and skip this transpose.
    return mu_t.T, std_t.T


def init_params(key, state_dim, action_dim, hidden=64):
    """Deterministic synthetic init (PyTorch-Linear-like uniform fan-in scaling)."""
    ks = jax.random.split(key, 8)

    def lin(kw, kb, fan_in, fan_out):
        bound = 1.0 / jnp.sqrt(fan_in)
        w = jax.random.uniform(kw, (fan_in, fan_out), jnp.float32, -bound, bound)
        b = jax.random.uniform(kb, (1, fan_out), jnp.float32, -bound, bound)
        return w, b

    w1, b1 = lin(ks[0], ks[1], state_dim, hidden)
    w2, b2 = lin(ks[2], ks[3], hidden, hidden)
    wmu, bmu = lin(ks[4], ks[5], hidden, action_dim)
    wls, bls = lin(ks[6], ks[7], hidden, action_dim)
    return dict(w1=w1, b1=b1, w2=w2, b2=b2, wmu=wmu, bmu=bmu, wls=wls, bls=bls)


def actor_ref(state, params, max_action):
    """Pure-JAX f32 reference matching the PyTorch forward."""
    h1 = jnp.maximum(state @ params["w1"] + params["b1"], 0.0)
    h2 = jnp.maximum(h1 @ params["w2"] + params["b2"], 0.0)
    mu = max_action * jnp.tanh(h2 @ params["wmu"] + params["bmu"])
    log_std = jnp.clip(h2 @ params["wls"] + params["bls"], -20.0, 2.0)
    return mu, jnp.exp(log_std)


if __name__ == "__main__":
    batch = 8
    state_dim = 16
    action_dim = 8
    max_action = 2.0

    key = jax.random.PRNGKey(0)
    k_state, k_params = jax.random.split(key)

    state = jax.random.normal(k_state, (batch, state_dim), jnp.float32)
    params = init_params(k_params, state_dim, action_dim)
    prepped = prepare_params(params)   # one-time: fuse heads, transpose, bf16

    # bf16 matmul inputs change numerics -> relaxed tolerances vs f32 reference.
    TOL = dict(atol=5e-2, rtol=5e-2)

    # Small-shape correctness check (single tile, TB == B).
    mu, std = actor_forward(state, prepped, max_action)
    jax.block_until_ready((mu, std))
    mu_ref, std_ref = actor_ref(state, params, max_action)
    assert mu.shape == (batch, action_dim) and std.shape == (batch, action_dim)
    assert jnp.allclose(mu, mu_ref, **TOL), "mu mismatch"
    assert jnp.allclose(std, std_ref, **TOL), "std mismatch"
    assert bool(jnp.all(std > 0.0)), "std must be positive"

    # Larger, non-tile-aligned batch: multi-step grid + partial last block
    # (no padding, no extra HBM passes).
    big_state = jax.random.normal(k_state, (3000, state_dim), jnp.float32)
    mu_b, std_b = actor_forward(big_state, prepped, max_action)
    jax.block_until_ready((mu_b, std_b))
    mu_br, std_br = actor_ref(big_state, params, max_action)
    assert jnp.allclose(mu_b, mu_br, **TOL), "mu mismatch (big batch)"
    assert jnp.allclose(std_b, std_br, **TOL), "std mismatch (big batch)"

    print("KERNEL_OK")
</pallas_src>

<mosaic_0001>
module attributes {stable_mosaic.version = 11 : i64} {
  func.func @kernel(%arg0: i32, %arg1: memref<16x8xbf16, #tpu.memory_space<vmem>>, %arg2: memref<64x16xbf16, #tpu.memory_space<vmem>>, %arg3: memref<64x1xf32, #tpu.memory_space<vmem>>, %arg4: memref<64x64xbf16, #tpu.memory_space<vmem>>, %arg5: memref<64x1xf32, #tpu.memory_space<vmem>>, %arg6: memref<16x64xbf16, #tpu.memory_space<vmem>>, %arg7: memref<16x1xf32, #tpu.memory_space<vmem>>, %arg8: memref<8x8xf32, #tpu.memory_space<vmem>>, %arg9: memref<8x8xf32, #tpu.memory_space<vmem>>) attributes {dimension_semantics = [#tpu.dimension_semantics<parallel>], iteration_bounds = array<i64: 1>, scalar_prefetch = 0 : i64, scratch_operands = 0 : i64, tpu.core_type = #tpu.core_type<tc>, window_params = [{transform_indices = @transform_0, window_bounds = array<i64: 16, 8>}, {pipeline_mode = #tpu.pipeline_mode<synchronous>, transform_indices = @transform_1, window_bounds = array<i64: 64, 16>}, {pipeline_mode = #tpu.pipeline_mode<synchronous>, transform_indices = @transform_2, window_bounds = array<i64: 64, 1>}, {pipeline_mode = #tpu.pipeline_mode<synchronous>, transform_indices = @transform_3, window_bounds = array<i64: 64, 64>}, {pipeline_mode = #tpu.pipeline_mode<synchronous>, transform_indices = @transform_4, window_bounds = array<i64: 64, 1>}, {pipeline_mode = #tpu.pipeline_mode<synchronous>, transform_indices = @transform_5, window_bounds = array<i64: 16, 64>}, {pipeline_mode = #tpu.pipeline_mode<synchronous>, transform_indices = @transform_6, window_bounds = array<i64: 16, 1>}, {transform_indices = @transform_7, window_bounds = array<i64: 8, 8>}, {transform_indices = @transform_8, window_bounds = array<i64: 8, 8>}]} {
    %c0 = arith.constant 0 : index
    %c0_0 = arith.constant 0 : index
    %0 = vector.load %arg1[%c0, %c0_0] : memref<16x8xbf16, #tpu.memory_space<vmem>>, vector<16x8xbf16>
    %c0_1 = arith.constant 0 : index
    %c0_2 = arith.constant 0 : index
    %1 = vector.load %arg2[%c0_1, %c0_2] : memref<64x16xbf16, #tpu.memory_space<vmem>>, vector<64x16xbf16>
    %cst = arith.constant dense<0.000000e+00> : vector<64x8xf32>
    %2 = tpu.matmul %1, %0, %cst {dimension_numbers = #tpu.dot_dimension_numbers<[1], [0], [0], [1], [0, 0, 1, 1], [], []>} : vector<64x16xbf16>, vector<16x8xbf16>, vector<64x8xf32> -> vector<64x8xf32>
    %c0_3 = arith.constant 0 : index
    %c0_4 = arith.constant 0 : index
    %3 = vector.load %arg3[%c0_3, %c0_4] : memref<64x1xf32, #tpu.memory_space<vmem>>, vector<64x1xf32>
    %4 = vector.broadcast %3 : vector<64x1xf32> to vector<64x8xf32>
    %5 = arith.addf %2, %4 : vector<64x8xf32>
    %cst_5 = arith.constant 0.000000e+00 : f32
    %6 = vector.broadcast %cst_5 : f32 to vector<64x8xf32>
    %7 = arith.maximumf %5, %6 : vector<64x8xf32>
    %8 = arith.truncf %7 : vector<64x8xf32> to vector<64x8xbf16>
    %c0_6 = arith.constant 0 : index
    %c0_7 = arith.constant 0 : index
    %9 = vector.load %arg4[%c0_6, %c0_7] : memref<64x64xbf16, #tpu.memory_space<vmem>>, vector<64x64xbf16>
    %cst_8 = arith.constant dense<0.000000e+00> : vector<64x8xf32>
    %10 = tpu.matmul %9, %8, %cst_8 {dimension_numbers = #tpu.dot_dimension_numbers<[1], [0], [0], [1], [0, 0, 1, 1], [], []>} : vector<64x64xbf16>, vector<64x8xbf16>, vector<64x8xf32> -> vector<64x8xf32>
    %c0_9 = arith.constant 0 : index
    %c0_10 = arith.constant 0 : index
    %11 = vector.load %arg5[%c0_9, %c0_10] : memref<64x1xf32, #tpu.memory_space<vmem>>, vector<64x1xf32>
    %12 = vector.broadcast %11 : vector<64x1xf32> to vector<64x8xf32>
    %13 = arith.addf %10, %12 : vector<64x8xf32>
    %cst_11 = arith.constant 0.000000e+00 : f32
    %14 = vector.broadcast %cst_11 : f32 to vector<64x8xf32>
    %15 = arith.maximumf %13, %14 : vector<64x8xf32>
    %16 = arith.truncf %15 : vector<64x8xf32> to vector<64x8xbf16>
    %c0_12 = arith.constant 0 : index
    %c0_13 = arith.constant 0 : index
    %17 = vector.load %arg6[%c0_12, %c0_13] : memref<16x64xbf16, #tpu.memory_space<vmem>>, vector<16x64xbf16>
    %cst_14 = arith.constant dense<0.000000e+00> : vector<16x8xf32>
    %18 = tpu.matmul %17, %16, %cst_14 {dimension_numbers = #tpu.dot_dimension_numbers<[1], [0], [0], [1], [0, 0, 1, 1], [], []>} : vector<16x64xbf16>, vector<64x8xbf16>, vector<16x8xf32> -> vector<16x8xf32>
    %c0_15 = arith.constant 0 : index
    %c0_16 = arith.constant 0 : index
    %19 = vector.load %arg7[%c0_15, %c0_16] : memref<16x1xf32, #tpu.memory_space<vmem>>, vector<16x1xf32>
    %20 = vector.broadcast %19 : vector<16x1xf32> to vector<16x8xf32>
    %21 = arith.addf %18, %20 : vector<16x8xf32>
    %22 = vector.extract_strided_slice %21 {offsets = [0, 0], sizes = [8, 8], strides = [1, 1]} : vector<16x8xf32> to vector<8x8xf32>
    %23 = vector.extract_strided_slice %21 {offsets = [8, 0], sizes = [8, 8], strides = [1, 1]} : vector<16x8xf32> to vector<8x8xf32>
    %24 = math.tanh %22 : vector<8x8xf32>
    %cst_17 = arith.constant 2.000000e+00 : f32
    %25 = vector.broadcast %cst_17 : f32 to vector<8x8xf32>
    %26 = arith.mulf %25, %24 : vector<8x8xf32>
    %c0_18 = arith.constant 0 : index
    %c0_19 = arith.constant 0 : index
    %27 = vector.load %arg8[%c0_18, %c0_19] : memref<8x8xf32, #tpu.memory_space<vmem>>, vector<8x8xf32>
    tpu.vector_store %arg8[%c0_18, %c0_19], %26 {strides = array<i32>} : memref<8x8xf32, #tpu.memory_space<vmem>>, vector<8x8xf32>,
    %cst_20 = arith.constant -2.000000e+01 : f32
    %cst_21 = arith.constant 2.000000e+00 : f32
    %28 = vector.broadcast %cst_20 : f32 to vector<8x8xf32>
    %29 = arith.maximumf %28, %23 : vector<8x8xf32>
    %30 = vector.broadcast %cst_21 : f32 to vector<8x8xf32>
    %31 = arith.minimumf %30, %29 : vector<8x8xf32>
    %32 = math.exp %31 : vector<8x8xf32>
    %c0_22 = arith.constant 0 : index
    %c0_23 = arith.constant 0 : index
    %33 = vector.load %arg9[%c0_22, %c0_23] : memref<8x8xf32, #tpu.memory_space<vmem>>, vector<8x8xf32>
    tpu.vector_store %arg9[%c0_22, %c0_23], %32 {strides = array<i32>} : memref<8x8xf32, #tpu.memory_space<vmem>>, vector<8x8xf32>,
    return
  }
  func.func @transform_0(%arg0: i32) -> (i32, i32) {
    %c0_i32 = arith.constant 0 : i32
    %c0_i32_0 = arith.constant 0 : i32
    return %c0_i32, %arg0 : i32, i32
  }
  func.func @transform_1(%arg0: i32) -> (i32, i32) {
    %c0_i32 = arith.constant 0 : i32
    %c0_i32_0 = arith.constant 0 : i32
    %c0_i32_1 = arith.constant 0 : i32
    return %c0_i32, %c0_i32_0 : i32, i32
  }
  func.func @transform_2(%arg0: i32) -> (i32, i32) {
    %c0_i32 = arith.constant 0 : i32
    %c0_i32_0 = arith.constant 0 : i32
    %c0_i32_1 = arith.constant 0 : i32
    return %c0_i32, %c0_i32_0 : i32, i32
  }
  func.func @transform_3(%arg0: i32) -> (i32, i32) {
    %c0_i32 = arith.constant 0 : i32
    %c0_i32_0 = arith.constant 0 : i32
    %c0_i32_1 = arith.constant 0 : i32
    return %c0_i32, %c0_i32_0 : i32, i32
  }
  func.func @transform_4(%arg0: i32) -> (i32, i32) {
    %c0_i32 = arith.constant 0 : i32
    %c0_i32_0 = arith.constant 0 : i32
    %c0_i32_1 = arith.constant 0 : i32
    return %c0_i32, %c0_i32_0 : i32, i32
  }
  func.func @transform_5(%arg0: i32) -> (i32, i32) {
    %c0_i32 = arith.constant 0 : i32
    %c0_i32_0 = arith.constant 0 : i32
    %c0_i32_1 = arith.constant 0 : i32
    return %c0_i32, %c0_i32_0 : i32, i32
  }
  func.func @transform_6(%arg0: i32) -> (i32, i32) {
    %c0_i32 = arith.constant 0 : i32
    %c0_i32_0 = arith.constant 0 : i32
    %c0_i32_1 = arith.constant 0 : i32
    return %c0_i32, %c0_i32_0 : i32, i32
  }
  func.func @transform_7(%arg0: i32) -> (i32, i32) {
    %c0_i32 = arith.constant 0 : i32
    %c0_i32_0 = arith.constant 0 : i32
    return %c0_i32, %arg0 : i32, i32
  }
  func.func @transform_8(%arg0: i32) -> (i32, i32) {
    %c0_i32 = arith.constant 0 : i32
    %c0_i32_0 = arith.constant 0 : i32
    return %c0_i32, %arg0 : i32, i32
  }
}

</mosaic_0001>

<bundles_post_ra>
// kernel: tpu_custom_call.1
= control target key start
LH: loop header
LB: loop body
LE: loop exit
PB: predicated region body
PF: predicated region fallthrough
CT: control target
= control target key end

     0   :  { %14 = vsyncpa [#allocation3], 0  ;;  %vm115_vm0 = vcmask 130048   ;;  %v615_v3 = vmov 0   ;;  %s784_s0 = inlined_call_operand.vmem [shape: bf16[16,8], index: 0, kind: input, shape index: {}]   ;;  %s785_s1 = inlined_call_operand.vmem [shape: bf16[64,16], index: 1, kind: input, shape index: {}]   ;;  %s786_s2 = inlined_call_operand.vmem [shape: f32[64,1], index: 2, kind: input, shape index: {}]   ;;  %s787_s3 = inlined_call_operand.vmem [shape: bf16[64,64], index: 3, kind: input, shape index: {}]   ;;  %s788_s4 = inlined_call_operand.vmem [shape: f32[64,1], index: 4, kind: input, shape index: {}]   ;;  %s789_s5 = inlined_call_operand.vmem [shape: bf16[16,64], index: 5, kind: input, shape index: {}]   ;;  %s790_s6 = inlined_call_operand.vmem [shape: f32[16,1], index: 6, kind: input, shape index: {}]   ;;  %s791_s7 = inlined_call_operand.hbm [shape: f32[8,8], index: 7, kind: output, shape index: {0}]   ;;  %s792_s8 = inlined_call_operand.hbm [shape: f32[8,8], index: 8, kind: output, shape index: {1}]  }
   0x1   :  { %v553_v0 = vld [vmem:[%s784_s0] sm:$0xff]   ;;  %v555_v2 = vld [vmem:[%s785_s1 + $0x8] sm:$0xff]   ;;  %551 = vset.pattern.permute.xlu0 %v615_v3  ;;  %v556_v4 = vld [vmem:[%s785_s1 + $0x10] sm:$0xff]   ;;  %552 = vset.pattern.permute.xlu1 %v615_v3 }
   0x2   :  { %v554_v1 = vld [vmem:[%s785_s1] sm:$0xff]   ;;  %508 = vmatprep.subr.bf16.mxu0 %v553_v0  ;;  %v43_v6 = vld [vmem:[%s786_s2 + $0x10] sm:$0xff]  ;;  %v42_v7 = vld [vmem:[%s786_s2 + $0x8] sm:$0xff] }
   0x3   :  { %509 = vmatpush3.bf16.msra.mxu0 %v553_v0  ;;  %510 = vmatprep.mubr.msk.bf16.mxu0 %vm115_vm0, %v554_v1  ;;  %v41_v5 = vld [vmem:[%s786_s2] sm:$0xff]  ;;  %v44_v8 = vld [vmem:[%s786_s2 + $0x18] sm:$0xff]  ;;  %v46_v11 = vld [vmem:[%s786_s2 + $0x28] sm:$0xff] }
   0x4   :  { %51 = vperm.xlu0 %551, %v41_v5   ;;  %61 = vperm.xlu1 %552, %v43_v6   ;;  %v557_v9 = vld [vmem:[%s785_s1 + $0x18] sm:$0xff]   ;;  %v45_v10 = vld [vmem:[%s786_s2 + $0x20] sm:$0xff] }
   0x6   :  { %511 = vmatmul.mubr.msk.bf16.vlgmr.msra.gmra.mrb[0].mxu0 %vm115_vm0, %v555_v2 }
   0x7   :  { %514 = vmatprep.mubr.msk.bf16.mxu0 %vm115_vm0, %v556_v4 }
   0x8   :  { %56 = vperm.xlu0 %551, %v42_v7   ;;  %66 = vperm.xlu1 %552, %v44_v8  }
   0xc   :  { %71 = vperm.xlu0 %551, %v45_v10  }
   0xe   :  { %515 = vmatmul.mubr.msk.bf16.gmra.mrb[4].mxu0 %vm115_vm0, %v557_v9 }
   0xf   :  { %15 = vsyncpa [#allocation5], 0  ;;  %76 = vperm.xlu1 %552, %v46_v11   ;;  %v47_v12 = vld [vmem:[%s786_s2 + $0x30] sm:$0xff]  ;;  %v48_v13 = vld [vmem:[%s786_s2 + $0x38] sm:$0xff]  ;;  %vm281_vm1 = vcmask 523264   ;;  %v616_v0 = vmov 0.0  }
  0x10   :  { %81 = vperm.xlu0 %551, %v47_v12   ;;  %v213_v14 = vld [vmem:[%s788_s4] sm:$0xff]  ;;  %v214_v15 = vld [vmem:[%s788_s4 + $0x8] sm:$0xff]  ;;  %v215_v16 = vld [vmem:[%s788_s4 + $0x10] sm:$0xff]  ;;  %534 = vmatprep.subr.bf16.mxu0 %v616_v0  ;;  %vm617_vm2 = vmmov 0   ;;  %s618_s9 = smov [#allocation2]   ;;  %vm436_vm3 = vcmask 64512  }
  0x11   :  { %v216_v17 = vld [vmem:[%s788_s4 + $0x18] sm:$0xff]  ;;  %v217_v18 = vld [vmem:[%s788_s4 + $0x20] sm:$0xff]  ;;  %v218_v19 = vld [vmem:[%s788_s4 + $0x28] sm:$0xff]  ;;  %542 = vmatprep.mubr.msk.bf16.mxu0 %vm617_vm2, %v616_v0  ;;  %s449_s10 = sshll.u32 %s618_s9, 4  ;;  %s450_s10 = int_to_ptr.vmem [resolvable:$true] %s449_s10 }
  0x12   :  { %v219_v20 = vld [vmem:[%s788_s4 + $0x30] sm:$0xff]  ;;  %v220_v21 = vld [vmem:[%s788_s4 + $0x38] sm:$0xff]  ;;  %v374_v22 = vld [vmem:[%s790_s6 + $0x8] sm:$0xff]  ;;  %s567_s12 = scalar_lea.vmem %s450_s10, 128  ;;  %p572_p1 = scmp.lt.s32.totalorder %s450_s10, %s450_s10 }
  0x13   :  { %86 = vperm.xlu1 %552, %v48_v13   ;;  %v373_v23 = vld [vmem:[%s790_s6] sm:$0xff]  ;;  %v559_v61 = vld [vmem:[%s787_s3 + $0x8] sm:$0xff]   ;;  %v560_v62 = vld [vmem:[%s787_s3 + $0x10] sm:$0xff]   ;;  %p568_p0 = scmp.ne.s32.totalorder %s450_s10, %s567_s12  ;;  %p573_p2 = scmp.lt.s32.totalorder %s567_s12, %s567_s12 }
  0x14   :  { %223 = vperm.xlu0 %551, %v213_v14   ;;  %v558_v24 = vld [vmem:[%s787_s3] sm:$0xff]   ;;  %v561_v63 = vld [vmem:[%s787_s3 + $0x18] sm:$0xff]  }
  0x15   :  { %526 = vmatprep.mubr.msk.bf16.mxu1 %vm281_vm1, %v558_v24  ;;  %p574_p3 = por %p573_p2, %p572_p1 }
  0x17   :  { %228 = vperm.xlu1 %552, %v214_v15   ;;  %p575_p4 = pnand %p574_p3, %p568_p0 }
  0x18   :  { %233 = vperm.xlu0 %551, %v215_v16  }
  0x1b   :  { %238 = vperm.xlu1 %552, %v216_v17  }
  0x1c   :  { %243 = vperm.xlu0 %551, %v217_v18  }
  0x1f   :  { %248 = vperm.xlu1 %552, %v218_v19  }
  0x20   :  { %253 = vperm.xlu0 %551, %v219_v20  }
  0x23   :  { %258 = vperm.xlu1 %552, %v220_v21  }
  0x24   :  { %382 = vperm.xlu0 %551, %v374_v22  }
  0x27   :  { %377 = vperm.xlu1 %552, %v373_v23  }
  0x83   :  { %v52_v25 = vpop.permute.xlu0 %51  ;;  %v62_v26 = vpop.permute.xlu1 %61 }
  0x87   :  { %v57_v27 = vpop.permute.xlu0 %56  ;;  %v67_v28 = vpop.permute.xlu1 %66 }
  0x8b   :  { %v72_v32 = vpop.permute.xlu0 %71 }
  0x8e   :  { %v77_v37 = vpop.permute.xlu1 %76 }
  0x8f   :  { %v82_v44 = vpop.permute.xlu0 %81 }
  0x92   :  { %v87_v49 = vpop.permute.xlu1 %86 }
  0x93   :  { %v224_v1 = vpop.permute.xlu0 %223 }
  0x96   :  { %v229_v2 = vpop.permute.xlu1 %228 }
  0x97   :  { %v234_v3 = vpop.permute.xlu0 %233 }
  0x9a   :  { %v239_v4 = vpop.permute.xlu1 %238 }
  0x9b   :  { %v244_v8 = vpop.permute.xlu0 %243 }
  0x9e   :  { %v249_v13 = vpop.permute.xlu1 %248 }
  0x9f   :  { %v254_v20 = vpop.permute.xlu0 %253 }
  0xd9   :  { %v512_v29 = vpop.f32.mrb[0].mxu0 }
  0xda   :  { %v171_v30 = vadd.f32 %v512_v29, %v62_v26  ;;  %v162_v31 = vpop.f32.mrb[1].mxu0 }
  0xdb   :  { %v163_v33 = vadd.f32 %v162_v31, %v52_v25  ;;  %v513_v34 = vpop.f32.mrb[2].mxu0  ;;  %v259_v25 = vpop.permute.xlu1 %258 }
  0xdc   :  { %v174_v35 = vadd.f32 %v513_v34, %v67_v28  ;;  %v165_v36 = vpop.f32.mrb[3].mxu0  ;;  %v195_v39 = vmax.f32 %v171_v30, 0.0 }
  0xdd   :  { %v166_v38 = vadd.f32 %v165_v36, %v57_v27  ;;  %v193_v41 = vmax.f32 %v163_v33, 0.0 }
  0xde   :  { %v196_v40 = vmax.f32 %v174_v35, 0.0 }
  0xdf   :  { %v194_v42 = vmax.f32 %v166_v38, 0.0  ;;  %v378_v38 = vpop.permute.xlu1 %377 }
  0xe0   :  { %v202_v43 = vpack.c.bf16 %v196_v40, %v195_v39 }
  0xe1   :  { %v516_v45 = vpop.f32.mrb[4].mxu0  ;;  %v201_v46 = vpack.c.bf16 %v194_v42, %v193_v41  ;;  %v383_v42 = vpop.permute.xlu0 %382 }
  0xe2   :  { %v187_v47 = vadd.f32 %v516_v45, %v82_v44  ;;  %v178_v48 = vpop.f32.mrb[5].mxu0 }
  0xe3   :  { %v179_v50 = vadd.f32 %v178_v48, %v72_v32  ;;  %v517_v51 = vpop.f32.mrb[6].mxu0  ;;  %518 = vmatprep.subr.bf16.mxu1 %v201_v46 }
  0xe4   :  { %v190_v52 = vadd.f32 %v517_v51, %v87_v49  ;;  %v181_v53 = vpop.f32.mrb[7].mxu0  ;;  %519 = vmatpush3.bf16.msra.mxu1 %v201_v46  ;;  %v199_v55 = vmax.f32 %v187_v47, 0.0 }
  0xe5   :  { %v182_v54 = vadd.f32 %v181_v53, %v77_v37  ;;  %520 = vmatprep.subr.bf16.mxu1 %v202_v43  ;;  %v197_v57 = vmax.f32 %v179_v50, 0.0  ;;  %v562_v37 = vld [vmem:[%s789_s5] sm:$0xff]   ;;  %s619_s5 = smov [#allocation4]  }
  0xe6   :  { %v200_v56 = vmax.f32 %v190_v52, 0.0  ;;  %s459_s11 = sshll.u32 %s619_s5, 4  ;;  %s460_s11 = int_to_ptr.vmem [resolvable:$true] %s459_s11 }
  0xe7   :  { %v198_v58 = vmax.f32 %v182_v54, 0.0 }
  0xe8   :  { %v204_v59 = vpack.c.bf16 %v200_v56, %v199_v55  ;;  %521 = vmatpush3.bf16.msra.mxu1 %v202_v43 }
  0xe9   :  { %v203_v60 = vpack.c.bf16 %v198_v58, %v197_v57 }
  0xeb   :  { %522 = vmatprep.subr.bf16.mxu1 %v203_v60 }
  0xec   :  { %523 = vmatpush3.bf16.msra.mxu1 %v203_v60 }
  0xed   :  { %524 = vmatprep.subr.bf16.mxu1 %v204_v59 }
  0xf0   :  { %525 = vmatpush3.bf16.msra.mxu1 %v204_v59 }
  0xf3   :  { %527 = vmatmul.mubr.msk.bf16.vlgmr.msra.gmra.mrb[0].mxu1 %vm281_vm1, %v559_v61 }
  0xf4   :  { %530 = vmatprep.mubr.msk.bf16.mxu1 %vm281_vm1, %v560_v62 }
  0xfb   :  { %531 = vmatmul.mubr.msk.bf16.gmra.mrb[4].mxu1 %vm281_vm1, %v561_v63 }
 0x1c6   :  { %v528_v5 = vpop.f32.mrb[0].mxu1 }
 0x1c7   :  { %v337_v6 = vadd.f32 %v528_v5, %v234_v3  ;;  %v328_v7 = vpop.f32.mrb[1].mxu1 }
 0x1c8   :  { %v329_v9 = vadd.f32 %v328_v7, %v224_v1  ;;  %v529_v10 = vpop.f32.mrb[2].mxu1 }
 0x1c9   :  { %v340_v11 = vadd.f32 %v529_v10, %v239_v4  ;;  %v331_v12 = vpop.f32.mrb[3].mxu1  ;;  %v361_v15 = vmax.f32 %v337_v6, 0.0 }
 0x1ca   :  { %v332_v14 = vadd.f32 %v331_v12, %v229_v2  ;;  %v359_v17 = vmax.f32 %v329_v9, 0.0 }
 0x1cb   :  { %v362_v16 = vmax.f32 %v340_v11, 0.0 }
 0x1cc   :  { %v360_v18 = vmax.f32 %v332_v14, 0.0 }
 0x1cd   :  { %v368_v19 = vpack.c.bf16 %v362_v16, %v361_v15 }
 0x1ce   :  { %v367_v21 = vpack.c.bf16 %v360_v18, %v359_v17  ;;  %v532_v22 = vpop.f32.mrb[4].mxu1 }
 0x1cf   :  { %v353_v23 = vadd.f32 %v532_v22, %v254_v20  ;;  %v344_v24 = vpop.f32.mrb[5].mxu1 }
 0x1d0   :  { %v345_v26 = vadd.f32 %v344_v24, %v244_v8  ;;  %v533_v27 = vpop.f32.mrb[6].mxu1  ;;  %535 = vmatpush3.bf16.msra.mxu0 %v367_v21 }
 0x1d1   :  { %v356_v28 = vadd.f32 %v533_v27, %v259_v25  ;;  %v347_v29 = vpop.f32.mrb[7].mxu1  ;;  %536 = vmatprep.subr.bf16.mxu0 %v616_v0  ;;  %v365_v31 = vmax.f32 %v353_v23, 0.0 }
 0x1d2   :  { %v348_v30 = vadd.f32 %v347_v29, %v249_v13  ;;  %v363_v33 = vmax.f32 %v345_v26, 0.0 }
 0x1d3   :  { %v366_v32 = vmax.f32 %v356_v28, 0.0 }
 0x1d4   :  { %v364_v34 = vmax.f32 %v348_v30, 0.0  ;;  %537 = vmatpush3.bf16.msra.mxu0 %v368_v19 }
 0x1d5   :  { %v370_v35 = vpack.c.bf16 %v366_v32, %v365_v31  ;;  %538 = vmatprep.subr.bf16.mxu0 %v616_v0 }
 0x1d6   :  { %v369_v36 = vpack.c.bf16 %v364_v34, %v363_v33 }
 0x1d8   :  { %539 = vmatpush3.bf16.msra.mxu0 %v369_v36 }
 0x1d9   :  { %540 = vmatprep.subr.bf16.mxu0 %v616_v0 }
 0x1dc   :  { %541 = vmatpush3.bf16.msra.mxu0 %v370_v35 }
 0x1df   :  { %543 = vmatmul.mubr.msk.bf16.vlgmr.msra.gmra.mrb[8].mxu0 %vm281_vm1, %v562_v37 }
 0x2b2   :  { %v427_v39 = vpop.f32.mrb[8].mxu0 }
 0x2b3   :  { %v428_v40 = vadd.f32 %v427_v39, %v378_v38  ;;  %v544_v41 = vpop.f32.mrb[9].mxu0 }
 0x2b4   :  { %v430_v43 = vpop.f32.mrb[10].mxu0 }
 0x2b5   :  { %563 = vtanh.f32 %v428_v40  ;;  %v431_v44 = vadd.f32 %v430_v43, %v383_v42  ;;  %v545_v45 = vpop.f32.mrb[11].mxu0 }
 0x2b7   :  { %v438_v46 = vmax.f32 %v431_v44, -20.0 }
 0x2b9   :  { %v439_v47 = vmin.f32 %v438_v46, 2.0 }
 0x2bb   :  { %v440_v48 = vmul.f32 1.442695, %v439_v47 }
 0x2bd   :  { %565 = vpow2.f32 %v440_v48 }
 0x2bf   :  { %v564_v49 = vpop.eup %563 }
 0x2c0   :  { %v435_v50 = vmul.f32 2.0, %v564_v49 }
 0x2c2   :  { %437 = vst.msk [vmem:[#allocation2] sm:$0xff] %vm436_vm3, %v435_v50 }
 0x2c3   :  { %578 = shalt.err (!%p575_p4)
}
 0x2c4   :  { %s579_s2 = scalar_lea.hbm %s791_s7, 128 }
 0x2c5   :  { %p580_p5 = scmp.ne.s32.totalorder %s791_s7, %s579_s2  ;;  %p583_p6 = scmp.lt.u32.totalorder %s579_s2, %s791_s7 }
 0x2c7   :  { %p585_p7 = pnand %p583_p6, %p580_p5 }
 0x2c9   :  { %588 = shalt.err (!%p585_p7)
}
 0x2ca   :  { %452 = dma.vmem_to_hbm [thread:$0]  %s450_s10, 128, %s791_s7, [#allocation3]   ;;  %v566_v51 = vpop.eup %565 }
 0x2cb   :  { %442 = vst.msk [vmem:[#allocation4] sm:$0xff] %vm436_vm3, %v566_v51  ;;  %s589_s20 = scalar_lea.vmem %s460_s11, 128  ;;  %p594_p9 = scmp.lt.s32.totalorder %s460_s11, %s460_s11 }
 0x2cc   :  { %p590_p8 = scmp.ne.s32.totalorder %s460_s11, %s589_s20  ;;  %p595_p10 = scmp.lt.s32.totalorder %s589_s20, %s589_s20 }
 0x2ce   :  { %p596_p11 = por %p595_p10, %p594_p9 }
 0x2d0   :  { %p597_p12 = pnand %p596_p11, %p590_p8 }
 0x2d2   :  { %600 = shalt.err (!%p597_p12)
}
 0x2d3   :  { %s601_s23 = scalar_lea.hbm %s792_s8, 128 }
 0x2d4   :  { %p602_p13 = scmp.ne.s32.totalorder %s792_s8, %s601_s23  ;;  %p605_p0 = scmp.lt.u32.totalorder %s601_s23, %s792_s8 }
 0x2d6   :  { %p607_p1 = pnand %p605_p0, %p602_p13 }
 0x2d8   :  { %610 = shalt.err (!%p607_p1)
}
 0x2d9   :  { %462 = dma.vmem_to_hbm [thread:$0]  %s460_s11, 128, %s792_s8, [#allocation5]  }
 0x2da   :  { %611 = dma.done.wait [#allocation3], 128  }
 0x2db   :  { %612 = vsyncadd [#allocation3], 4294967168 }
 0x2dc   :  { %613 = dma.done.wait [#allocation5], 128  }
 0x2dd   :  { %614 = vsyncadd [#allocation5], 4294967168 }
 0x2de   :  { %469 = vsyncpa [#allocation3], 1 }
 0x2df   :  { %470 = vsyncpa [#allocation5], 1 }

</bundles_post_ra>
